<compile_context>
chip_gen: v5e
topology: v5e:2x2
jax: 0.10.0
libtpu: 0.0.40
codegen_flags: <defaults>
</compile_context>

<pallas_src>
import jax
import jax.numpy as jnp
from jax.experimental import pallas as pl
from jax.experimental.pallas import tpu as pltpu


def _make_mlp_kernel(num_layers: int, last_is_reduce: bool):
    """Fused MLP kernel; batch on lanes, features on sublanes."""

    def kernel(x_ref, *rest):
        # rest = (w0, b0, w1, b1, ..., w_{L-1}, b_{L-1}, out)
        out_ref = rest[-1]
        params = rest[:-1]
        h = x_ref[...]  # (d_in, tile) float32
        for i in range(num_layers):
            w = params[2 * i][...]        # hidden: (d_out, d_in); last(reduce): (d_in, 1)
            b = params[2 * i + 1][...]    # (d_out, 1)
            is_last = i == num_layers - 1
            if is_last and last_is_reduce:
                # 1-wide final layer: VPU multiply (lane broadcast of w) +
                # sublane reduction on the XLU.  Avoids a 1-column MXU matmul.
                h = jnp.sum(w * h, axis=0, keepdims=True) + b
            else:
                # (d_out, d_in) @ (d_in, tile) -> (d_out, tile); batch = MXU N axis.
                h = jnp.dot(w, h, preferred_element_type=jnp.float32) + b
            if not is_last:
                h = jnp.maximum(h, 0.0)  # nn.ReLU
        out_ref[...] = h.astype(out_ref.dtype)

    return kernel


def _padded_tile_bytes(shape, itemsize=4):
    r, c = shape
    return ((r + 7) // 8 * 8) * ((c + 127) // 128 * 128) * itemsize


def mlp_forward(x, weights, biases, *, batch_tile=1024):
    """Fused MLP forward.

    x:        (B, n_features) float32
    weights:  list of PyTorch-layout (d_out, d_in) float32 arrays
    biases:   list of (d_out,) float32 arrays
    returns:  (B,) float32   (last layer has d_out == 1, then .view(-1))
    """
    B, F = x.shape
    num_layers = len(weights)
    assert num_layers >= 1

    # Batch-on-lanes layout: work on x^T so batch is lane-dense.
    xT = x.T  # (F, B)

    # Tile the lane (batch) axis.  The block's last dim must be a multiple of
    # 128 or equal to the (padded) full dim.
    if B <= batch_tile:
        tile = B
        Bp = B
    else:
        tile = max(128, (batch_tile // 128) * 128)
        Bp = ((B + tile - 1) // tile) * tile
        if Bp != B:
            xT = jnp.pad(xT, ((0, 0), (0, Bp - B)))
    grid = (Bp // tile,)

    # Kernel-side parameter layouts.
    last_is_reduce = int(weights[-1].shape[0]) == 1
    kweights = list(weights)
    if last_is_reduce:
        kweights[-1] = weights[-1].reshape(-1, 1)          # (d_in, 1)
    kbiases = [b.reshape(-1, 1) for b in biases]           # (d_out, 1) lane-broadcast

    # BlockSpecs: x / out tiled over batch; params as full resident blocks.
    in_specs = [pl.BlockSpec((F, tile), lambda i: (0, i))]
    for w, b in zip(kweights, kbiases):
        in_specs.append(pl.BlockSpec(w.shape, lambda i: (0, 0)))
        in_specs.append(pl.BlockSpec(b.shape, lambda i: (0, 0)))
    out_specs = pl.BlockSpec((1, tile), lambda i: (0, i))
    out_shape = jax.ShapeDtypeStruct((1, Bp), x.dtype)

    # Advisory cost estimate for XLA scheduling around this kernel.
    flops = 2 * Bp * sum(int(w.shape[0]) * int(w.shape[1]) for w in weights)
    bytes_accessed = (
        int(xT.size + Bp) * 4
        + sum(int(w.size) * 4 for w in kweights)
        + sum(int(b.size) * 4 for b in kbiases)
    )
    cost = pl.CostEstimate(
        flops=flops, transcendentals=0, bytes_accessed=bytes_accessed
    )

    # VMEM budget: double-buffered x/out tiles + resident params, with headroom,
    # clamped to v7x's 64 MiB physical VMEM.
    vmem = 2 * _padded_tile_bytes((F, tile)) + 2 * _padded_tile_bytes((1, tile))
    for w, b in zip(kweights, kbiases):
        vmem += 2 * _padded_tile_bytes(w.shape) + 2 * _padded_tile_bytes(b.shape)
    vmem_limit = int(min(max(2 * vmem + (4 << 20), 32 << 20), 64 << 20))

    kernel = _make_mlp_kernel(num_layers, last_is_reduce)

    args = [xT]
    for w, b in zip(kweights, kbiases):
        args.extend([w, b])

    y = pl.pallas_call(
        kernel,
        out_shape=out_shape,
        grid_spec=pltpu.PrefetchScalarGridSpec(
            num_scalar_prefetch=0,
            grid=grid,
            in_specs=in_specs,
            out_specs=out_specs,
        ),
        compiler_params=pltpu.CompilerParams(
            dimension_semantics=("parallel",),
            vmem_limit_bytes=vmem_limit,
        ),
        cost_estimate=cost,
    )(*args)

    # Equivalent of PyTorch `.view(-1)`; drop batch padding if any.
    return y.reshape(-1)[:B]


def init_mlp_params(key, n_features, hidden_layer_sizes):
    """nn.Linear-style init; weights in PyTorch layout (d_out, d_in)."""
    dims = [n_features] + list(hidden_layer_sizes) + [1]
    weights, biases = [], []
    for d_in, d_out in zip(dims[:-1], dims[1:]):
        key, kw, kb = jax.random.split(key, 3)
        bound = 1.0 / float(d_in) ** 0.5
        w = jax.random.uniform(kw, (d_out, d_in), jnp.float32, -bound, bound)
        b = jax.random.uniform(kb, (d_out,), jnp.float32, -bound, bound)
        weights.append(w)
        biases.append(b)
    return weights, biases


def mlp_reference(x, weights, biases):
    """Pure-JAX reference matching the PyTorch forward (torch weight layout)."""
    h = x
    for i, (w, b) in enumerate(zip(weights, biases)):
        h = h @ w.T + b
        if i < len(weights) - 1:
            h = jnp.maximum(h, 0.0)
    return h.reshape(-1)


if __name__ == "__main__":
    key = jax.random.PRNGKey(0)

    # Small shapes consistent with the module: Mlp(n_features=4, [32, 16]).
    n_features = 4
    hidden_layer_sizes = [32, 16]

    key, kp = jax.random.split(key)
    weights, biases = init_mlp_params(kp, n_features, hidden_layer_sizes)

    # (batch, batch_tile): multi-step grid, padded batch, and small-batch paths.
    cases = [(256, 128), (300, 128), (8, 1024)]
    for batch, tile in cases:
        key, kx = jax.random.split(key)
        x = jax.random.normal(kx, (batch, n_features), jnp.float32)

        y = mlp_forward(x, weights, biases, batch_tile=tile)
        y = jax.block_until_ready(y)

        y_ref = mlp_reference(x, weights, biases)
        assert y.shape == (batch,), (y.shape, batch)
        assert jnp.allclose(y, y_ref, atol=1e-5, rtol=1e-5), (
            f"mismatch vs reference for batch={batch}, tile={tile}"
        )

    print("KERNEL_OK")
</pallas_src>

<mosaic_0001>
module attributes {stable_mosaic.version = 11 : i64} {
  func.func @kernel(%arg0: i32, %arg1: memref<4x128xf32, #tpu.memory_space<vmem>>, %arg2: memref<32x4xf32, #tpu.memory_space<vmem>>, %arg3: memref<32x1xf32, #tpu.memory_space<vmem>>, %arg4: memref<16x32xf32, #tpu.memory_space<vmem>>, %arg5: memref<16x1xf32, #tpu.memory_space<vmem>>, %arg6: memref<16x1xf32, #tpu.memory_space<vmem>>, %arg7: memref<1x1xf32, #tpu.memory_space<vmem>>, %arg8: memref<1x128xf32, #tpu.memory_space<vmem>>) attributes {dimension_semantics = [#tpu.dimension_semantics<parallel>], iteration_bounds = array<i64: 2>, scalar_prefetch = 0 : i64, scratch_operands = 0 : i64, tpu.core_type = #tpu.core_type<tc>, window_params = [{transform_indices = @transform_0, window_bounds = array<i64: 4, 128>}, {pipeline_mode = #tpu.pipeline_mode<synchronous>, transform_indices = @transform_1, window_bounds = array<i64: 32, 4>}, {pipeline_mode = #tpu.pipeline_mode<synchronous>, transform_indices = @transform_2, window_bounds = array<i64: 32, 1>}, {pipeline_mode = #tpu.pipeline_mode<synchronous>, transform_indices = @transform_3, window_bounds = array<i64: 16, 32>}, {pipeline_mode = #tpu.pipeline_mode<synchronous>, transform_indices = @transform_4, window_bounds = array<i64: 16, 1>}, {pipeline_mode = #tpu.pipeline_mode<synchronous>, transform_indices = @transform_5, window_bounds = array<i64: 16, 1>}, {pipeline_mode = #tpu.pipeline_mode<synchronous>, transform_indices = @transform_6, window_bounds = array<i64: 1, 1>}, {transform_indices = @transform_7, window_bounds = array<i64: 1, 128>}]} {
    %c0 = arith.constant 0 : index
    %c0_0 = arith.constant 0 : index
    %0 = vector.load %arg1[%c0, %c0_0] : memref<4x128xf32, #tpu.memory_space<vmem>>, vector<4x128xf32>
    %c0_1 = arith.constant 0 : index
    %c0_2 = arith.constant 0 : index
    %1 = vector.load %arg2[%c0_1, %c0_2] : memref<32x4xf32, #tpu.memory_space<vmem>>, vector<32x4xf32>
    %c0_3 = arith.constant 0 : index
    %c0_4 = arith.constant 0 : index
    %2 = vector.load %arg3[%c0_3, %c0_4] : memref<32x1xf32, #tpu.memory_space<vmem>>, vector<32x1xf32>
    %cst = arith.constant dense<0.000000e+00> : vector<32x128xf32>
    %3 = tpu.matmul %1, %0, %cst {dimension_numbers = #tpu.dot_dimension_numbers<[1], [0], [0], [1], [0, 0, 1, 1], [], []>} : vector<32x4xf32>, vector<4x128xf32>, vector<32x128xf32> -> vector<32x128xf32>
    %4 = vector.broadcast %2 : vector<32x1xf32> to vector<32x128xf32>
    %5 = arith.addf %3, %4 : vector<32x128xf32>
    %cst_5 = arith.constant 0.000000e+00 : f32
    %6 = vector.broadcast %cst_5 : f32 to vector<32x128xf32>
    %7 = arith.maximumf %5, %6 : vector<32x128xf32>
    %c0_6 = arith.constant 0 : index
    %c0_7 = arith.constant 0 : index
    %8 = vector.load %arg4[%c0_6, %c0_7] : memref<16x32xf32, #tpu.memory_space<vmem>>, vector<16x32xf32>
    %c0_8 = arith.constant 0 : index
    %c0_9 = arith.constant 0 : index
    %9 = vector.load %arg5[%c0_8, %c0_9] : memref<16x1xf32, #tpu.memory_space<vmem>>, vector<16x1xf32>
    %cst_10 = arith.constant dense<0.000000e+00> : vector<16x128xf32>
    %10 = tpu.matmul %8, %7, %cst_10 {dimension_numbers = #tpu.dot_dimension_numbers<[1], [0], [0], [1], [0, 0, 1, 1], [], []>} : vector<16x32xf32>, vector<32x128xf32>, vector<16x128xf32> -> vector<16x128xf32>
    %11 = vector.broadcast %9 : vector<16x1xf32> to vector<16x128xf32>
    %12 = arith.addf %10, %11 : vector<16x128xf32>
    %cst_11 = arith.constant 0.000000e+00 : f32
    %13 = vector.broadcast %cst_11 : f32 to vector<16x128xf32>
    %14 = arith.maximumf %12, %13 : vector<16x128xf32>
    %c0_12 = arith.constant 0 : index
    %c0_13 = arith.constant 0 : index
    %15 = vector.load %arg6[%c0_12, %c0_13] : memref<16x1xf32, #tpu.memory_space<vmem>>, vector<16x1xf32>
    %c0_14 = arith.constant 0 : index
    %c0_15 = arith.constant 0 : index
    %16 = vector.load %arg7[%c0_14, %c0_15] : memref<1x1xf32, #tpu.memory_space<vmem>>, vector<1x1xf32>
    %17 = vector.broadcast %15 : vector<16x1xf32> to vector<16x128xf32>
    %18 = arith.mulf %17, %14 : vector<16x128xf32>
    %cst_16 = arith.constant dense<0.000000e+00> : vector<128xf32>
    %19 = vector.multi_reduction <add>, %18, %cst_16 [0] : vector<16x128xf32> to vector<128xf32>
    %20 = vector.shape_cast %19 : vector<128xf32> to vector<1x128xf32>
    %21 = vector.broadcast %16 : vector<1x1xf32> to vector<1x128xf32>
    %22 = arith.addf %20, %21 : vector<1x128xf32>
    %c0_17 = arith.constant 0 : index
    %c0_18 = arith.constant 0 : index
    %23 = vector.load %arg8[%c0_17, %c0_18] : memref<1x128xf32, #tpu.memory_space<vmem>>, vector<1x128xf32>
    tpu.vector_store %arg8[%c0_17, %c0_18], %22 {strides = array<i32>} : memref<1x128xf32, #tpu.memory_space<vmem>>, vector<1x128xf32>,
    return
  }
  func.func @transform_0(%arg0: i32) -> (i32, i32) {
    %c0_i32 = arith.constant 0 : i32
    %c0_i32_0 = arith.constant 0 : i32
    return %c0_i32, %arg0 : i32, i32
  }
  func.func @transform_1(%arg0: i32) -> (i32, i32) {
    %c0_i32 = arith.constant 0 : i32
    %c0_i32_0 = arith.constant 0 : i32
    %c0_i32_1 = arith.constant 0 : i32
    return %c0_i32, %c0_i32_0 : i32, i32
  }
  func.func @transform_2(%arg0: i32) -> (i32, i32) {
    %c0_i32 = arith.constant 0 : i32
    %c0_i32_0 = arith.constant 0 : i32
    %c0_i32_1 = arith.constant 0 : i32
    return %c0_i32, %c0_i32_0 : i32, i32
  }
  func.func @transform_3(%arg0: i32) -> (i32, i32) {
    %c0_i32 = arith.constant 0 : i32
    %c0_i32_0 = arith.constant 0 : i32
    %c0_i32_1 = arith.constant 0 : i32
    return %c0_i32, %c0_i32_0 : i32, i32
  }
  func.func @transform_4(%arg0: i32) -> (i32, i32) {
    %c0_i32 = arith.constant 0 : i32
    %c0_i32_0 = arith.constant 0 : i32
    %c0_i32_1 = arith.constant 0 : i32
    return %c0_i32, %c0_i32_0 : i32, i32
  }
  func.func @transform_5(%arg0: i32) -> (i32, i32) {
    %c0_i32 = arith.constant 0 : i32
    %c0_i32_0 = arith.constant 0 : i32
    %c0_i32_1 = arith.constant 0 : i32
    return %c0_i32, %c0_i32_0 : i32, i32
  }
  func.func @transform_6(%arg0: i32) -> (i32, i32) {
    %c0_i32 = arith.constant 0 : i32
    %c0_i32_0 = arith.constant 0 : i32
    %c0_i32_1 = arith.constant 0 : i32
    return %c0_i32, %c0_i32_0 : i32, i32
  }
  func.func @transform_7(%arg0: i32) -> (i32, i32) {
    %c0_i32 = arith.constant 0 : i32
    %c0_i32_0 = arith.constant 0 : i32
    return %c0_i32, %arg0 : i32, i32
  }
}

</mosaic_0001>

<bundles_post_ra>
// kernel: tpu_custom_call.1
= control target key start
LH: loop header
LB: loop body
LE: loop exit
PB: predicated region body
PF: predicated region fallthrough
CT: control target
= control target key end

     0   :  { %s799_s0 = inlined_call_operand.vmem [shape: f32[4,256], index: 0, kind: input, shape index: {}]   ;;  %s800_s1 = inlined_call_operand.vmem [shape: f32[32,4], index: 1, kind: input, shape index: {}]   ;;  %s801_s2 = inlined_call_operand.vmem [shape: f32[32,1], index: 2, kind: input, shape index: {}]   ;;  %s802_s3 = inlined_call_operand.vmem [shape: f32[16,32], index: 3, kind: input, shape index: {}]   ;;  %s803_s4 = inlined_call_operand.vmem [shape: f32[16,1], index: 4, kind: input, shape index: {}]   ;;  %s804_s5 = inlined_call_operand.vmem [shape: f32[16,1], index: 5, kind: input, shape index: {}]   ;;  %s805_s6 = inlined_call_operand.<no memory space> [shape: f32[1,1], index: 6, kind: input, shape index: {}]   ;;  %s806_s7 = inlined_call_operand.hbm [shape: f32[1,256], index: 7, kind: output, shape index: {}]  }
   0x1   :  { %v12_v0 = vstv %s805_s6 }
   0x2   :  { %13 = vst [vmem:[#allocation2] sm:$0x1] %v12_v0 }
   0x3   :  { %14 = vsyncpa [#allocation4], 0 }
   0x4   :  { %16 = vsyncpa [#allocation4 + $0x1], 0  ;;  %s668_s26 = smov 0   ;;  %s670_s27 = smov 0  }
   0x5   :  { %s672_s28 = smov 0   ;;  %s674_s29 = smov 0  }
   0x6 LB: > { %s689_s6 = sadd.s32 4294967295, %s622_s29   ;;  %s498_s30 = sadd.s32 4294967294, %s622_s29   ;;  %s622_s29 = sphi %s674_s29, %s812_s29   ;;  %s618_s28 = sphi %s672_s28, %s811_s28   ;;  %s614_s27 = sphi %s670_s27, %s810_s27   ;;  %s610_s26 = sphi %s668_s26, %s809_s26  }
   0x7   : > { %s693_s8 = sadd.s32 1, %s622_s29   ;;  %s181_s9 = sadd.s32 1, %s618_s28 }
   0x8   : > { %s178_s10 = ssub.s32 %s622_s29, %s693_s8  ;;  %p191_p0 = scmp.ne.s32.totalorder %s618_s28, %s614_s27 }
   0x9   : > { %p179_p1 = scmp.eq.s32.totalorder %s178_s10, 0  ;;  %p192_p2 = scmp.eq.s32.totalorder %s689_s6, 1 }
   0xa   : > { %p197_p3 = scmp.ne.s32.totalorder %s614_s27, %s610_s26  ;;  %p198_p4 = scmp.eq.s32.totalorder %s498_s30, 1 }
   0xb   : > { %s704_s11 = scalar_select %p179_p1, %s618_s28, %s181_s9  }
   0xc   : > { %p706_p5 = por %p192_p2, %p191_p0  ;;  %p710_p6 = por %p198_p4, %p197_p3 }
   0xd   : > { %p501_p7 = scmp.ge.s32.totalorder %s622_s29, 1  ;;  %p241_p8 = scmp.lt.s32.totalorder %s622_s29, 3 }
   0xf   : > { %p242_p9 = pnand %p501_p7, %p241_p8 }
  0x10   : > { %p271_p10 = scmp.lt.s32.totalorder (!%p242_p9), %s689_s6, 1  ;;  %s269_s17 = sand.u32 (!%p242_p9), 1, %s614_s27  }
  0x11   : > { %245 = sbr.rel (%p242_p9) target bundleno = 336 (0x150), region = 48  ;;  %s439_s20 = scalar_lea.hbm (!%p242_p9), %s806_s7, %s689_s6 }
  0x12   : > { %s270_s21 = scalar_lea.vmem (!%p242_p9), [#allocation3], %s269_s17  ;;  %s443_s23 = sshll.u32 (!%p242_p9), %s439_s20, 4  ;;  %s444_s23 = int_to_ptr.hbm [resolvable:$true] %s443_s23 }
  0x13   : > { %s431_s24 = scalar_lea.sflag (!%p242_p9), [#allocation4], %s269_s17  ;;  %s574_s25 = sshra.s32 (!%p242_p9), %s444_s23, 4  ;;  %s575_s25 = int_to_ptr.hbm [resolvable:$true] %s574_s25 }
  0x14   : > { %s576_s30 = scalar_lea.hbm (!%p242_p9), %s575_s25, 1  ;;  %s580_s10 = scalar_lea.hbm (!%p242_p9), %s806_s7, 2 }
  0x15   : > { %p577_p11 = scmp.ne.s32.totalorder (!%p242_p9), %s575_s25, %s576_s30  ;;  %p581_p0 = scmp.lt.s32.totalorder (!%p242_p9), %s575_s25, %s806_s7 }
  0x16   : > { %v283_v1 = vld [vmem:[%s801_s2 + $0x18] sm:$0xff]  ;;  %v624_v2 = vmov 0   ;;  %v281_v3 = vld [vmem:[%s801_s2 + $0x8] sm:$0xff]  ;;  %s272_s18 = scalar_select %p271_p10, %s689_s6, 1  ;;  %vm317_vm0 = vcmask 1043456   ;;  %v278_v4 = vld [vmem:[%s800_s1 + $0x10] sm:$0xff] }
  0x17   : > { %557 = vset.pattern.permute.xlu0 %v624_v2  ;;  %558 = vset.pattern.permute.xlu1 %v624_v2  ;;  %vm304_vm1 = vcmask 31744   ;;  %v276_v5 = vld [vmem:[%s800_s1] sm:$0xff]  ;;  %v282_v7 = vld [vmem:[%s801_s2 + $0x10] sm:$0xff]  ;;  %v279_v9 = vld [vmem:[%s800_s1 + $0x18] sm:$0xff]  ;;  %vm368_vm2 = vcmask 261120   ;;  %p578_p12 = pnand %p577_p11, %p706_p5  ;;  %p582_p1 = scmp.lt.s32.totalorder %s580_s10, %s576_s30 }
  0x18   : > { %301 = vperm.xlu0 %557, %v283_v1   ;;  %291 = vperm.xlu1 %558, %v281_v3   ;;  %s502_s19 = sshll.u32 %s272_s18, 2  ;;  %v280_v8 = vld [vmem:[%s801_s2] sm:$0xff]  ;;  %v277_v10 = vld [vmem:[%s800_s1 + $0x8] sm:$0xff] }
  0x19   : > { %559 = vset.pattern.permute.xlu2 %v624_v2  ;;  %s274_s22 = scalar_lea.vmem %s799_s0, %s502_s19  ;;  %v400_v11 = vld [vmem:[%s804_s5] sm:$0xff]  ;;  %v401_v12 = vld [vmem:[%s804_s5 + $0x8] sm:$0xff]  ;;  %p579_p13 = pneg %p578_p12 }
  0x1a   : > { %v275_v6 = vld [vmem:[%s274_s22] sm:$0xf]  ;;  %v357_v14 = vld [vmem:[%s803_s4 + $0x8] sm:$0xff]  ;;  %s441_s22 = sshll.u32 %s270_s21, 4  ;;  %p583_p2 = por %p582_p1, %p581_p0  ;;  %s442_s22 = int_to_ptr.vmem [resolvable:$true] %s441_s22 }
  0x1b   : > { %512 = vmatpush.msk.msra.mxu2 %vm317_vm0, %v275_v6  ;;  %503 = vmatpush.msk.msra.mxu0 %vm317_vm0, %v275_v6  ;;  %v356_v13 = vld [vmem:[%s803_s4] sm:$0xff]  ;;  %v355_v33 = vld [vmem:[%s802_s3 + $0x8] sm:$0xff] }
  0x1c   : > { %506 = vmatmul.msk.f32.vlgmr.msra.gmra.mxu2 %vm304_vm1, %v278_v4  ;;  %504 = vmatmul.msk.f32.vlgmr.msra.gmra.mxu0 %vm304_vm1, %v276_v5  ;;  %v402_v19 = vld [vmem:[#allocation2] sm:$0x1]  ;;  %p584_p3 = pnand %p583_p2, %p579_p13 }
  0x1d   : > { %360 = vperm.xlu2 %559, %v356_v13   ;;  %v354_v32 = vld [vmem:[%s802_s3] sm:$0xff] }
  0x20   : > { %296 = vperm.xlu0 %557, %v282_v7   ;;  %286 = vperm.xlu1 %558, %v280_v8  }
  0x24   : > { %507 = vmatmul.msk.f32.gmra.mxu2 %vm304_vm1, %v279_v9  ;;  %505 = vmatmul.msk.f32.gmra.mxu0 %vm304_vm1, %v277_v10 }
  0x25   : > { %365 = vperm.xlu2 %559, %v357_v14  }
  0x28   : > { %405 = vperm.xlu0 %557, %v400_v11   ;;  %410 = vperm.xlu1 %558, %v401_v12  }
  0x2d   : > { %424 = vperm.xlu2 %559, %v402_v19  }
  0x77   : > { %v361_v34 = vpop.permute.xlu2 %360 }
  0x7f   : > { %v366_v37 = vpop.permute.xlu2 %365 }
  0x87   : > { %v425_v51 = vpop.permute.xlu2 %424 }
  0x88   : > { %v427_v53 = vperm.slane %v425_v51, 0 }
  0x8a   : > { %v302_v15 = vpop.permute.xlu0 %301  ;;  %v292_v18 = vpop.permute.xlu1 %291 }
  0x92   : > { %v297_v20 = vpop.permute.xlu0 %296  ;;  %v287_v27 = vpop.permute.xlu1 %286 }
  0x99   : > { %v338_v16 = vpop.f32.mrf.mxu0 }
  0x9a   : > { %v339_v28 = vadd.f32 %v338_v16, %v287_v27  ;;  %v406_v42 = vpop.permute.xlu0 %405  ;;  %v411_v43 = vpop.permute.xlu1 %410 }
  0x9c   : > { %v350_v31 = vmax.f32 %v339_v28, 0.0 }
  0x9f   : > { %v344_v17 = vpop.f32.mrf.mxu2 }
  0xa0   : > { %v345_v23 = vadd.f32 %v344_v17, %v297_v20 }
  0xa1   : > { %v341_v21 = vpop.f32.mrf.mxu0 }
  0xa2   : > { %v342_v25 = vadd.f32 %v341_v21, %v292_v18  ;;  %v352_v29 = vmax.f32 %v345_v23, 0.0 }
  0xa4   : > { %v351_v30 = vmax.f32 %v342_v25, 0.0 }
  0xa7   : > { %v347_v22 = vpop.f32.mrf.mxu2 }
  0xa8   : > { %v348_v24 = vadd.f32 %v347_v22, %v302_v15 }
  0xaa   : > { %v353_v26 = vmax.f32 %v348_v24, 0.0 }
  0xac   : > { %387 = vmatpush.msra.mxu1 %v353_v26  ;;  %513 = vmatpush.msra.mxu3 %v353_v26 }
  0xae   : > { %388 = vmatpush.msra.mxu1 %v352_v29  ;;  %514 = vmatpush.msra.mxu3 %v352_v29 }
  0xb0   : > { %389 = vmatpush.msra.mxu1 %v351_v30  ;;  %515 = vmatpush.msra.mxu3 %v351_v30 }
  0xb2   : > { %390 = vmatpush.msra.mxu1 %v350_v31  ;;  %516 = vmatpush.msra.mxu3 %v350_v31 }
  0xb3   : > { %508 = vmatmul.msk.f32.vlgmr.msra.gmra.mxu1 %vm368_vm2, %v354_v32  ;;  %509 = vmatmul.msk.f32.vlgmr.msra.gmra.mxu3 %vm368_vm2, %v355_v33 }
 0x130   : > { %v392_v35 = vpop.f32.mrf.mxu1 }
 0x131   : > { %v393_v36 = vadd.f32 %v392_v35, %v361_v34 }
 0x133   : > { %v398_v39 = vmax.f32 %v393_v36, 0.0 }
 0x135   : > { %v413_v44 = vmul.f32 %v406_v42, %v398_v39 }
 0x136   : > { %v395_v38 = vpop.f32.mrf.mxu3 }
 0x137   : > { %v396_v40 = vadd.f32 %v395_v38, %v366_v37 }
 0x139   : > { %v399_v41 = vmax.f32 %v396_v40, 0.0 }
 0x13b   : > { %v414_v45 = vmul.f32 %v411_v43, %v399_v41 }
 0x13d   : > { %v415_v46 = vadd.f32 %v414_v45, %v413_v44 }
 0x13f   : > { %v416_v47 = vrot.slane %v415_v46, 4 }
 0x141   : > { %v417_v48 = vadd.f32 %v416_v47, %v415_v46 }
 0x143   : > { %v418_v49 = vrot.slane %v417_v48, 2 }
 0x145   : > { %v419_v50 = vadd.f32 %v418_v49, %v417_v48 }
 0x147   : > { %v420_v52 = vrot.slane %v419_v50, 1 }
 0x149   : > { %v421_v54 = vadd.f32 %v420_v52, %v419_v50 }
 0x14b   : > { %v428_v55 = vadd.f32 %v427_v53, %v421_v54 }
 0x14d   : > { %429 = vst [vmem:[%s270_s21] sm:$0x1] %v428_v55 }
 0x14e   : > { %587 = shalt.err (!%p584_p3)
}
 0x14f   : > { %517 = dma.vmem_to_hbm [thread:$0]  (%p706_p5), %s442_s22, 16, %s444_s23, %s431_s24  }
 0x150 PF: > { %p523_p4 = scmp.ge.s32.totalorder %s622_s29, 2  ;;  %s455_s16 = sand.u32 1, %s610_s26  }
 0x151   : > { %s456_s17 = scalar_lea.sflag [#allocation4], %s455_s16 }
 0x152   : > { %p520_p7 = pnand %p523_p4, %p710_p6 }
 0x154   : > { %p521_p8 = pneg %p520_p7 }
 0x156   : > { %605 = dma.done.wait (%p521_p8), %s456_s17, 16  }
 0x157   : > { %607 = vsyncadd (%p521_p8), %s456_s17, 4294967280  ;;  %p19_p9 = scmp.ge.s32.totalorder %s693_s8, 4   ;;  %s809_s26 = smov %s614_s27 }
 0x158   : > { %s810_s27 = smov %s618_s28  ;;  %s811_s28 = smov %s704_s11 }
 0x159   : > { %s812_s29 = smov %s693_s8  ;;  %21 = sbr.rel (!%p19_p9) target bundleno = 6 (0x6), region = 83 }
 0x15e   :  { %461 = vsyncpa [#allocation4], 1 }
 0x15f   :  { %463 = vsyncpa [#allocation4 + $0x1], 1 }

</bundles_post_ra>
